<compile_context>
chip_gen: v7x
topology: tpu7x:2x2x1
jax: 0.10.0
libtpu: 0.0.40
codegen_flags: <defaults>
</compile_context>

<pallas_src>
import functools

import jax
import jax.numpy as jnp
from jax.experimental import pallas as pl
from jax.experimental.pallas import tpu as pltpu


def _round_up(x: int, m: int) -> int:
    return ((x + m - 1) // m) * m


def _rbf_kernel(x_ref, cT_ref, csq_ref, ngamma_ref, out_ref):
    # x_ref:      (tm, F)   f32 VMEM
    # cT_ref:     (F, tn)   f32 VMEM   (centers pre-transposed in wrapper)
    # csq_ref:    (1, tn)   f32 VMEM   (||c_h||^2, precomputed)
    # ngamma_ref: (1, tn)   f32 VMEM   (-1 / (2 sigma_h^2), precomputed)
    # out_ref:    (tm, tn)  f32 VMEM
    x = x_ref[...]                                           # (tm, F)
    x_sq = jnp.sum(x * x, axis=-1, keepdims=True)            # (tm, 1)
    # ||x - c||^2 = ||x||^2 + ||c||^2 - 2 <x, c>  (MXU does the inner product)
    xc = jnp.dot(x, cT_ref[...], preferred_element_type=jnp.float32)  # (tm, tn)
    d2 = jnp.maximum(x_sq + csq_ref[...] - 2.0 * xc, 0.0)    # clamp FP negatives
    out_ref[...] = jnp.exp(d2 * ngamma_ref[...]).astype(out_ref.dtype)


@functools.partial(jax.jit, static_argnames=("tm", "tn"))
def rbf_layer(x: jax.Array, centers: jax.Array, sigmas: jax.Array,
              *, tm: int = 256, tn: int = 512) -> jax.Array:
    """phi[b, h] = exp(-||x_b - centers_h||^2 / (2 sigmas_h^2))."""
    B, F = x.shape
    H, Fc = centers.shape
    assert F == Fc, "feature_size mismatch"

    # Tile sizes: clamp to (padded) problem size; tm multiple of 8, tn of 128.
    tm = min(tm, _round_up(B, 8))
    tn = min(tn, _round_up(H, 128))
    B_pad = _round_up(B, tm)
    H_pad = _round_up(H, tn)

    x_p = x.astype(jnp.float32)
    if B_pad != B:
        x_p = jnp.pad(x_p, ((0, B_pad - B), (0, 0)))

    c = centers.astype(jnp.float32)
    sig = sigmas.astype(jnp.float32)
    if H_pad != H:
        c = jnp.pad(c, ((0, H_pad - H), (0, 0)))
        # pad sigmas with 1.0 so the padded -1/(2 s^2) stays finite
        sig = jnp.pad(sig, (0, H_pad - H), constant_values=1.0)

    # One-time per-parameter precompute (hoisted out of the per-B-tile loop).
    cT = c.T                                                  # (F, H_pad)
    c_sq = jnp.sum(c * c, axis=-1).reshape(1, H_pad)          # (1, H_pad)
    neg_gamma = (-0.5 / (sig * sig)).reshape(1, H_pad)        # (1, H_pad)

    grid = (B_pad // tm, H_pad // tn)

    out = pl.pallas_call(
        _rbf_kernel,
        out_shape=jax.ShapeDtypeStruct((B_pad, H_pad), jnp.float32),
        grid_spec=pltpu.PrefetchScalarGridSpec(
            num_scalar_prefetch=0,
            grid=grid,
            in_specs=[
                pl.BlockSpec((tm, F), lambda i, j: (i, 0)),   # x tile
                pl.BlockSpec((F, tn), lambda i, j: (0, j)),   # centers^T tile
                pl.BlockSpec((1, tn), lambda i, j: (0, j)),   # ||c||^2 row
                pl.BlockSpec((1, tn), lambda i, j: (0, j)),   # -1/(2 sigma^2) row
            ],
            out_specs=pl.BlockSpec((tm, tn), lambda i, j: (i, j)),
        ),
        compiler_params=pltpu.CompilerParams(
            dimension_semantics=("parallel", "parallel"),
            vmem_limit_bytes=48 * 1024 * 1024,
        ),
    )(x_p, cT, c_sq, neg_gamma)

    return out[:B, :H]


def rbf_reference(x, centers, sigmas):
    # Pure-JAX reference mirroring the PyTorch code path exactly.
    diff = x[:, None, :] - centers[None, :, :]          # (B, H, F)
    dist = jnp.sqrt(jnp.sum(diff * diff, axis=-1))      # (B, H)
    return jnp.exp(-(dist ** 2) / (2.0 * sigmas[None, :] ** 2))


if __name__ == "__main__":
    key = jax.random.PRNGKey(0)

    # Case 1: module-consistent small shapes (H padded to 128 lanes internally).
    batch, feature_size, hidden_size = 8, 32, 64
    k_x, k_c, k_s, key = *jax.random.split(key, 3), jax.random.split(key, 4)[3]
    x = jax.random.uniform(k_x, (batch, feature_size), dtype=jnp.float32)
    centers = jax.random.uniform(k_c, (hidden_size, feature_size), dtype=jnp.float32)
    sigmas = jax.random.uniform(k_s, (hidden_size,), dtype=jnp.float32) + 0.1

    phi = jax.block_until_ready(rbf_layer(x, centers, sigmas))
    phi_ref = rbf_reference(x, centers, sigmas)
    assert phi.shape == (batch, hidden_size)
    assert jnp.allclose(phi, phi_ref, atol=1e-5, rtol=1e-5), "mismatch vs reference (case 1)"

    # Case 2: ragged shapes exercising B/H padding + multi-tile grid.
    batch2, feature2, hidden2 = 37, 48, 200
    k_x2, k_c2, k_s2 = jax.random.split(key, 3)
    x2 = jax.random.uniform(k_x2, (batch2, feature2), dtype=jnp.float32)
    centers2 = jax.random.uniform(k_c2, (hidden2, feature2), dtype=jnp.float32)
    sigmas2 = jax.random.uniform(k_s2, (hidden2,), dtype=jnp.float32) + 0.1

    phi2 = jax.block_until_ready(rbf_layer(x2, centers2, sigmas2, tm=16, tn=128))
    phi2_ref = rbf_reference(x2, centers2, sigmas2)
    assert phi2.shape == (batch2, hidden2)
    assert jnp.allclose(phi2, phi2_ref, atol=1e-5, rtol=1e-5), "mismatch vs reference (case 2)"

    print("KERNEL_OK")
</pallas_src>

<mosaic_0001>
module attributes {stable_mosaic.version = 11 : i64} {
  func.func @_rbf_kernel(%arg0: i32, %arg1: i32, %arg2: memref<8x32xf32, #tpu.memory_space<vmem>>, %arg3: memref<32x128xf32, #tpu.memory_space<vmem>>, %arg4: memref<1x128xf32, #tpu.memory_space<vmem>>, %arg5: memref<1x128xf32, #tpu.memory_space<vmem>>, %arg6: memref<8x128xf32, #tpu.memory_space<vmem>>) attributes {dimension_semantics = [#tpu.dimension_semantics<parallel>, #tpu.dimension_semantics<parallel>], iteration_bounds = array<i64: 1, 1>, scalar_prefetch = 0 : i64, scratch_operands = 0 : i64, tpu.core_type = #tpu.core_type<tc>, window_params = [{transform_indices = @transform_0, window_bounds = array<i64: 8, 32>}, {transform_indices = @transform_1, window_bounds = array<i64: 32, 128>}, {transform_indices = @transform_2, window_bounds = array<i64: 1, 128>}, {transform_indices = @transform_3, window_bounds = array<i64: 1, 128>}, {transform_indices = @transform_4, window_bounds = array<i64: 8, 128>}]} {
    %c0 = arith.constant 0 : index
    %c0_0 = arith.constant 0 : index
    %0 = vector.load %arg2[%c0, %c0_0] : memref<8x32xf32, #tpu.memory_space<vmem>>, vector<8x32xf32>
    %1 = arith.mulf %0, %0 : vector<8x32xf32>
    %cst = arith.constant dense<0.000000e+00> : vector<8xf32>
    %2 = vector.multi_reduction <add>, %1, %cst [1] : vector<8x32xf32> to vector<8xf32>
    %3 = vector.shape_cast %2 : vector<8xf32> to vector<8x1xf32>
    %c0_1 = arith.constant 0 : index
    %c0_2 = arith.constant 0 : index
    %4 = vector.load %arg3[%c0_1, %c0_2] : memref<32x128xf32, #tpu.memory_space<vmem>>, vector<32x128xf32>
    %cst_3 = arith.constant dense<0.000000e+00> : vector<8x128xf32>
    %5 = tpu.matmul %0, %4, %cst_3 {dimension_numbers = #tpu.dot_dimension_numbers<[1], [0], [0], [1], [0, 0, 1, 1], [], []>} : vector<8x32xf32>, vector<32x128xf32>, vector<8x128xf32> -> vector<8x128xf32>
    %c0_4 = arith.constant 0 : index
    %c0_5 = arith.constant 0 : index
    %6 = vector.load %arg4[%c0_4, %c0_5] : memref<1x128xf32, #tpu.memory_space<vmem>>, vector<1x128xf32>
    %7 = vector.broadcast %3 : vector<8x1xf32> to vector<8x128xf32>
    %8 = vector.broadcast %6 : vector<1x128xf32> to vector<8x128xf32>
    %9 = arith.addf %7, %8 : vector<8x128xf32>
    %cst_6 = arith.constant 2.000000e+00 : f32
    %10 = vector.broadcast %cst_6 : f32 to vector<8x128xf32>
    %11 = arith.mulf %10, %5 : vector<8x128xf32>
    %12 = arith.subf %9, %11 : vector<8x128xf32>
    %cst_7 = arith.constant 0.000000e+00 : f32
    %13 = vector.broadcast %cst_7 : f32 to vector<8x128xf32>
    %14 = arith.maximumf %12, %13 : vector<8x128xf32>
    %c0_8 = arith.constant 0 : index
    %c0_9 = arith.constant 0 : index
    %15 = vector.load %arg5[%c0_8, %c0_9] : memref<1x128xf32, #tpu.memory_space<vmem>>, vector<1x128xf32>
    %16 = vector.broadcast %15 : vector<1x128xf32> to vector<8x128xf32>
    %17 = arith.mulf %14, %16 : vector<8x128xf32>
    %18 = math.exp %17 : vector<8x128xf32>
    %c0_10 = arith.constant 0 : index
    %c0_11 = arith.constant 0 : index
    %19 = vector.load %arg6[%c0_10, %c0_11] : memref<8x128xf32, #tpu.memory_space<vmem>>, vector<8x128xf32>
    tpu.vector_store %arg6[%c0_10, %c0_11], %18 {strides = array<i32>} : memref<8x128xf32, #tpu.memory_space<vmem>>, vector<8x128xf32>,
    return
  }
  func.func @transform_0(%arg0: i32, %arg1: i32) -> (i32, i32) {
    %c0_i32 = arith.constant 0 : i32
    %c0_i32_0 = arith.constant 0 : i32
    return %arg0, %c0_i32 : i32, i32
  }
  func.func @transform_1(%arg0: i32, %arg1: i32) -> (i32, i32) {
    %c0_i32 = arith.constant 0 : i32
    %c0_i32_0 = arith.constant 0 : i32
    return %c0_i32, %arg1 : i32, i32
  }
  func.func @transform_2(%arg0: i32, %arg1: i32) -> (i32, i32) {
    %c0_i32 = arith.constant 0 : i32
    %c0_i32_0 = arith.constant 0 : i32
    return %c0_i32, %arg1 : i32, i32
  }
  func.func @transform_3(%arg0: i32, %arg1: i32) -> (i32, i32) {
    %c0_i32 = arith.constant 0 : i32
    %c0_i32_0 = arith.constant 0 : i32
    return %c0_i32, %arg1 : i32, i32
  }
  func.func @transform_4(%arg0: i32, %arg1: i32) -> (i32, i32) {
    %c0_i32 = arith.constant 0 : i32
    return %arg0, %arg1 : i32, i32
  }
}

</mosaic_0001>

<bundles_post_ra>
// kernel: rbf_layer.1
= control target key start
LH: loop header
LB: loop body
LE: loop exit
PB: predicated region body
PF: predicated region fallthrough
CT: control target
= control target key end

     0   :  { %v192_v3 = vmov 0.0|0.0   ;;  %vm193_vm0 = vmmov 0   ;;  %v194_v6 = vmov 0.0   ;;  %s254_s0 = inlined_call_operand.vmem [shape: f32[8,32], index: 0, kind: input, shape index: {}]   ;;  %s255_s1 = inlined_call_operand.vmem [shape: f32[32,128], index: 1, kind: input, shape index: {}]   ;;  %s256_s2 = inlined_call_operand.vmem [shape: f32[1,128], index: 2, kind: input, shape index: {}]   ;;  %s257_s3 = inlined_call_operand.vmem [shape: f32[1,128], index: 3, kind: input, shape index: {}]   ;;  %s258_s4 = inlined_call_operand.hbm [shape: f32[8,128], index: 4, kind: output, shape index: {}]  }
   0x1   :  { %v24_v0 = vld [vmem:[%s255_s1] sm:$0xff]  ;;  %v25_v1 = vld [vmem:[%s255_s1 + $0x8] sm:$0xff]  ;;  %v26_v2 = vld [vmem:[%s255_s1 + $0x10] sm:$0xff]  ;;  %156 = vmatprep.subr.bf16.mxu0 %v192_v3  ;;  %153 = vmatprep.mubr.msk.f32.mxu0 %vm193_vm0, %v194_v6 }
   0x2   :  { %v157_v4 = vpack.c.bf16 %v25_v1, %v24_v0  ;;  %v27_v5 = vld [vmem:[%s255_s1 + $0x18] sm:$0xff]  ;;  %v18_v7 = vld [vmem:[%s254_s0] sm:$0xff] }
   0x3   :  { %9 = vsyncpa [#allocation3], 0  ;;  %v19_v8 = vmul.f32 %v18_v7, %v18_v7  ;;  %v160_v9 = vpack.c.bf16 %v27_v5, %v26_v2  ;;  %vm20_vm1 = vcmask 261120   ;;  %v138_v12 = vld [vmem:[%s256_s2] ss:$0 sm:$0xff]  ;;  %s195_s27 = smov [#allocation2]  }
   0x4   :  { %158 = vmatpush3.bf16.msra.mxu0 %v157_v4  ;;  %v139_v18 = vld [vmem:[%s257_s3] ss:$0 sm:$0xff]  ;;  %s129_s28 = sshll.u32 %s195_s27, 4  ;;  %s130_s28 = int_to_ptr.vmem [resolvable:$true] %s129_s28 }
   0x5   :  { %159 = vmatprep.subr.bf16.mxu0 %v192_v3  ;;  %v21_v10 = vsel %vm20_vm1, %v19_v8, 0.0  ;;  %s168_s29 = scalar_lea.vmem %s130_s28, 128  ;;  %p173_p1 = scmp.lt.s32.totalorder %s130_s28, %s130_s28 }
   0x6   :  { %22 = vadd.xlane.f32.xlu0 %v21_v10  ;;  %p169_p0 = scmp.ne.s32.totalorder %s130_s28, %s168_s29  ;;  %p174_p2 = scmp.lt.s32.totalorder %s168_s29, %s168_s29 }
   0x8   :  { %161 = vmatpush3.bf16.msra.mxu0 %v160_v9  ;;  %p175_p3 = por %p174_p2, %p173_p1 }
   0xa   :  { %p176_p4 = pnand %p175_p3, %p169_p0 }
   0xb   :  { %154 = vmatmul.mubr.msk.f32.vlgmr.msra.gmra.mrb[0].mxu0 %vm20_vm1, %v18_v7 }
  0x93   :  { %v23_v11 = vpop.xlane.xlu0 %22 }
  0x94   :  { %v108_v13 = vadd.f32 %v138_v12, %v23_v11 }
  0xde   :  { %v97_v14 = vpop.f32.mrb[0].mxu0 }
  0xdf   :  { %v109_v15 = vmul.f32 2.0, %v97_v14  ;;  %v155_v16 = vpop.f32.mrb[1].mxu0 }
  0xe1   :  { %v110_v17 = vsub.f32 %v108_v13, %v109_v15 }
  0xe3   :  { %v111_v19 = vmax.f32 %v110_v17, 0.0 }
  0xe5   :  { %v119_v20 = vmul.f32 %v139_v18, %v111_v19 }
  0xe7   :  { %v120_v21 = vmul.f32 1.442695, %v119_v20 }
  0xe9   :  { %166 = vpow2.f32 %v120_v21 }
  0xf3   :  { %v167_v22 = vpop.eup %166 }
  0xf4   :  { %122 = vst [vmem:[#allocation2] sm:$0xff] %v167_v22 }
  0xf5   :  { %179 = shalt.err (!%p176_p4)
}
  0xf6   :  { %s180_s3 = scalar_lea.hbm %s258_s4, 128 }
  0xf7   :  { %p181_p5 = scmp.ne.s32.totalorder %s258_s4, %s180_s3  ;;  %p184_p6 = scmp.lt.u32.totalorder %s180_s3, %s258_s4 }
  0xf9   :  { %p186_p7 = pnand %p184_p6, %p181_p5 }
  0xfb   :  { %189 = shalt.err (!%p186_p7)
}
  0xfc   :  { %132 = dma.vmem_to_hbm [thread:$0]  %s130_s28, 128, %s258_s4, [#allocation3]  }
  0xfd   :  { %190 = dma.done.wait [#allocation3], 128  }
  0xfe   :  { %191 = vsyncadd [#allocation3], 4294967168 }
  0xff   :  { %136 = vsyncpa [#allocation3], 1 }

</bundles_post_ra>
